<compile_context>
chip_gen: v7x
topology: tpu7x:2x2x1
jax: 0.10.0
libtpu: 0.0.40
codegen_flags: <defaults>
</compile_context>

<pallas_src>
import jax
import jax.numpy as jnp
from jax.experimental import pallas as pl
from jax.experimental.pallas import tpu as pltpu

MIN_STD = 1e-4
LANE = 128
SUBLANE = 8


def _round_up(x, m):
    return (x + m - 1) // m * m


# --------------------------------------------------------------------------
# Kernel
# --------------------------------------------------------------------------
def _plan_proposal_kernel(xp_ref, xg_ref,
                          w1p_ref, w1g_ref, b1_ref,
                          w2_ref, b2_ref,
                          w3_ref, b3_ref,
                          w4_ref, b4_ref,
                          wm_ref, bm_ref,
                          wsd_ref, bsd_ref,
                          mean_ref, std_ref):
    """Whole MLP for one batch tile: MXU matmuls with f32 accumulation."""
    w1p = w1p_ref[...]
    cdt = w1p.dtype                                   # compute dtype (bf16)

    xp = xp_ref[...].astype(cdt)
    xg = xg_ref[...].astype(cdt)

    # Layer 1: fused "concat" -> two matmuls sharing one f32 accumulator.
    h = jnp.dot(xp, w1p, preferred_element_type=jnp.float32)
    h = h + jnp.dot(xg, w1g_ref[...], preferred_element_type=jnp.float32)
    h = jnp.maximum(h + b1_ref[...], 0.0)

    def dense_relu(h, w_ref, b_ref):
        y = jnp.dot(h.astype(cdt), w_ref[...],
                    preferred_element_type=jnp.float32)
        return jnp.maximum(y + b_ref[...], 0.0)

    h = dense_relu(h, w2_ref, b2_ref)
    h = dense_relu(h, w3_ref, b3_ref)
    h = dense_relu(h, w4_ref, b4_ref)

    # fc_state split into mean / std column blocks -> both outputs lane-aligned.
    hc = h.astype(cdt)
    mean = jnp.dot(hc, wm_ref[...],
                   preferred_element_type=jnp.float32) + bm_ref[...]
    s_pre = jnp.dot(hc, wsd_ref[...],
                    preferred_element_type=jnp.float32) + bsd_ref[...]
    # softplus via logaddexp -> exp/log on the EUP slot (free here).
    std = jnp.logaddexp(s_pre, 0.0) + MIN_STD

    mean_ref[...] = mean.astype(mean_ref.dtype)
    std_ref[...] = std.astype(std_ref.dtype)


# --------------------------------------------------------------------------
# Parameter packing (layout plumbing, done once)
# --------------------------------------------------------------------------
def pack_params(params, perceptual_features, compute_dtype=jnp.bfloat16):
    """Split w1 / ws, zero-pad feature dims to lane multiples, cast weights."""
    w1 = params["w1"]
    P = perceptual_features
    in_features, H = w1.shape
    G = in_features - P
    pf = params["ws"].shape[-1] // 2

    H_pad = _round_up(H, LANE)
    pf_pad = _round_up(pf, LANE)

    def padw(w, rows, cols):
        w = jnp.pad(w, ((0, rows - w.shape[0]), (0, cols - w.shape[1])))
        return w.astype(compute_dtype)

    def padb(b, cols):
        return jnp.pad(b, ((0, 0), (0, cols - b.shape[1]))).astype(jnp.float32)

    packed = dict(
        w1p=padw(w1[:P, :], P, H_pad),
        w1g=padw(w1[P:, :], G, H_pad),
        b1=padb(params["b1"], H_pad),
        w2=padw(params["w2"], H_pad, H_pad),
        b2=padb(params["b2"], H_pad),
        w3=padw(params["w3"], H_pad, H_pad),
        b3=padb(params["b3"], H_pad),
        w4=padw(params["w4"], H_pad, H_pad),
        b4=padb(params["b4"], H_pad),
        wm=padw(params["ws"][:, :pf], H_pad, pf_pad),
        bm=padb(params["bs"][:, :pf], pf_pad),
        wsd=padw(params["ws"][:, pf:], H_pad, pf_pad),
        bsd=padb(params["bs"][:, pf:], pf_pad),
    )
    meta = dict(P=P, G=G, H=H, H_pad=H_pad, pf=pf, pf_pad=pf_pad)
    return packed, meta


# --------------------------------------------------------------------------
# Wrapper
# --------------------------------------------------------------------------
_WEIGHT_ORDER = ["w1p", "w1g", "b1", "w2", "b2", "w3", "b3", "w4", "b4",
                 "wm", "bm", "wsd", "bsd"]


def plan_proposal_forward(initial_percep_emb, latent_goal, packed, meta):
    B = initial_percep_emb.shape[0]
    P, G = meta["P"], meta["G"]
    H_pad, pf, pf_pad = meta["H_pad"], meta["pf"], meta["pf_pad"]

    # Batch tiling: pad to sublane multiple; tile across grid (parallel axis).
    tb = 128
    B_pad = _round_up(B, SUBLANE)
    if B_pad <= tb:
        tb = B_pad
    else:
        B_pad = _round_up(B_pad, tb)
    grid = (B_pad // tb,)

    xp = initial_percep_emb.astype(jnp.float32)
    xg = latent_goal.astype(jnp.float32)
    if B_pad != B:
        xp = jnp.pad(xp, ((0, B_pad - B), (0, 0)))
        xg = jnp.pad(xg, ((0, B_pad - B), (0, 0)))

    weight_args = [packed[k] for k in _WEIGHT_ORDER]

    def batch_spec(cols):
        return pl.BlockSpec((tb, cols), lambda i: (i, 0))

    def full_spec(arr):
        # Whole array resident; constant block index -> not re-fetched per tile.
        return pl.BlockSpec(arr.shape, lambda i: (0, 0))

    in_specs = ([batch_spec(P), batch_spec(G)]
                + [full_spec(a) for a in weight_args])
    out_specs = [batch_spec(pf_pad), batch_spec(pf_pad)]

    # Cost / VMEM hints.
    param_bytes = sum(int(a.size) * a.dtype.itemsize for a in weight_args)
    act_bytes = 4 * tb * (P + G + 4 * H_pad + 2 * pf_pad) * 4  # rough, double-buffered
    flops = 2 * B_pad * ((P + G) * H_pad + 3 * H_pad * H_pad + 2 * H_pad * pf_pad)
    cost = pl.CostEstimate(
        flops=int(flops),
        transcendentals=int(B_pad * pf_pad),
        bytes_accessed=int(param_bytes + (xp.size + xg.size) * 4
                           + 2 * B_pad * pf_pad * 4),
    )
    vmem_limit = int(min(max(2 * param_bytes + act_bytes + (8 << 20), 32 << 20),
                         64 << 20))

    mean_p, std_p = pl.pallas_call(
        _plan_proposal_kernel,
        out_shape=(
            jax.ShapeDtypeStruct((B_pad, pf_pad), jnp.float32),
            jax.ShapeDtypeStruct((B_pad, pf_pad), jnp.float32),
        ),
        grid_spec=pltpu.PrefetchScalarGridSpec(
            num_scalar_prefetch=0,
            grid=grid,
            in_specs=in_specs,
            out_specs=out_specs,
        ),
        compiler_params=pltpu.CompilerParams(
            dimension_semantics=("parallel",),
            vmem_limit_bytes=vmem_limit,
        ),
        cost_estimate=cost,
    )(xp, xg, *weight_args)

    # Strip batch / lane padding.
    return mean_p[:B, :pf], std_p[:B, :pf]


# --------------------------------------------------------------------------
# Synthetic params + pure-JAX reference (mirrors bf16 compute, f32 accumulate)
# --------------------------------------------------------------------------
def init_params(key, perceptual_features, latent_goal_features,
                hidden_size, plan_features):
    in_features = perceptual_features + latent_goal_features
    dims = [
        (in_features, hidden_size),
        (hidden_size, hidden_size),
        (hidden_size, hidden_size),
        (hidden_size, hidden_size),
        (hidden_size, 2 * plan_features),
    ]
    names = ["1", "2", "3", "4", "s"]
    params = {}
    for name, (din, dout) in zip(names, dims):
        key, kw, kb = jax.random.split(key, 3)
        scale = 1.0 / jnp.sqrt(jnp.float32(din))
        params[f"w{name}"] = jax.random.uniform(
            kw, (din, dout), jnp.float32, -scale, scale)
        params[f"b{name}"] = jax.random.uniform(
            kb, (1, dout), jnp.float32, -scale, scale)
    return params


def reference_forward(initial_percep_emb, latent_goal, params,
                      compute_dtype=jnp.bfloat16):
    x = jnp.concatenate([initial_percep_emb, latent_goal], axis=-1)
    h = x
    for n in ["1", "2", "3", "4"]:
        h = jnp.dot(h.astype(compute_dtype),
                    params[f"w{n}"].astype(compute_dtype),
                    preferred_element_type=jnp.float32) + params[f"b{n}"]
        h = jnp.maximum(h, 0.0)
    s = jnp.dot(h.astype(compute_dtype), params["ws"].astype(compute_dtype),
                preferred_element_type=jnp.float32) + params["bs"]
    pf = s.shape[-1] // 2
    return s[:, :pf], jnp.logaddexp(s[:, pf:], 0.0) + MIN_STD


# --------------------------------------------------------------------------
if __name__ == "__main__":
    batch = 2
    perceptual_features = 32
    latent_goal_features = 16
    hidden_size = 32
    plan_features = 8

    key = jax.random.PRNGKey(0)
    key, k_p, k_g, k_params = jax.random.split(key, 4)

    initial_percep_emb = jax.random.normal(
        k_p, (batch, perceptual_features), jnp.float32)
    latent_goal = jax.random.normal(
        k_g, (batch, latent_goal_features), jnp.float32)

    params = init_params(k_params, perceptual_features, latent_goal_features,
                         hidden_size, plan_features)
    packed, meta = pack_params(params, perceptual_features,
                               compute_dtype=jnp.bfloat16)

    # Small demo shapes (single batch tile).
    mean, std = plan_proposal_forward(initial_percep_emb, latent_goal,
                                      packed, meta)
    jax.block_until_ready((mean, std))

    ref_mean, ref_std = reference_forward(initial_percep_emb, latent_goal,
                                          params)
    assert mean.shape == (batch, plan_features)
    assert std.shape == (batch, plan_features)
    assert jnp.allclose(mean, ref_mean, atol=2e-2, rtol=2e-2)
    assert jnp.allclose(std, ref_std, atol=2e-2, rtol=2e-2)
    assert bool(jnp.all(std > 0.0))

    # Larger batch: exercises the multi-tile parallel grid path (+ padding).
    key, k_p2, k_g2 = jax.random.split(key, 3)
    big_b = 200
    pe_big = jax.random.normal(k_p2, (big_b, perceptual_features), jnp.float32)
    lg_big = jax.random.normal(k_g2, (big_b, latent_goal_features), jnp.float32)
    mean_b, std_b = plan_proposal_forward(pe_big, lg_big, packed, meta)
    jax.block_until_ready((mean_b, std_b))
    ref_mean_b, ref_std_b = reference_forward(pe_big, lg_big, params)
    assert mean_b.shape == (big_b, plan_features)
    assert jnp.allclose(mean_b, ref_mean_b, atol=2e-2, rtol=2e-2)
    assert jnp.allclose(std_b, ref_std_b, atol=2e-2, rtol=2e-2)

    print("KERNEL_OK")
</pallas_src>

<mosaic_0001>
module attributes {stable_mosaic.version = 11 : i64} {
  func.func @_plan_proposal_kernel(%arg0: i32, %arg1: memref<8x32xf32, #tpu.memory_space<vmem>>, %arg2: memref<8x16xf32, #tpu.memory_space<vmem>>, %arg3: memref<32x128xbf16, #tpu.memory_space<vmem>>, %arg4: memref<16x128xbf16, #tpu.memory_space<vmem>>, %arg5: memref<1x128xf32, #tpu.memory_space<vmem>>, %arg6: memref<128x128xbf16, #tpu.memory_space<vmem>>, %arg7: memref<1x128xf32, #tpu.memory_space<vmem>>, %arg8: memref<128x128xbf16, #tpu.memory_space<vmem>>, %arg9: memref<1x128xf32, #tpu.memory_space<vmem>>, %arg10: memref<128x128xbf16, #tpu.memory_space<vmem>>, %arg11: memref<1x128xf32, #tpu.memory_space<vmem>>, %arg12: memref<128x128xbf16, #tpu.memory_space<vmem>>, %arg13: memref<1x128xf32, #tpu.memory_space<vmem>>, %arg14: memref<128x128xbf16, #tpu.memory_space<vmem>>, %arg15: memref<1x128xf32, #tpu.memory_space<vmem>>, %arg16: memref<8x128xf32, #tpu.memory_space<vmem>>, %arg17: memref<8x128xf32, #tpu.memory_space<vmem>>) attributes {dimension_semantics = [#tpu.dimension_semantics<parallel>], iteration_bounds = array<i64: 1>, scalar_prefetch = 0 : i64, scratch_operands = 0 : i64, tpu.core_type = #tpu.core_type<tc>, window_params = [{transform_indices = @transform_0, window_bounds = array<i64: 8, 32>}, {transform_indices = @transform_1, window_bounds = array<i64: 8, 16>}, {pipeline_mode = #tpu.pipeline_mode<synchronous>, transform_indices = @transform_2, window_bounds = array<i64: 32, 128>}, {pipeline_mode = #tpu.pipeline_mode<synchronous>, transform_indices = @transform_3, window_bounds = array<i64: 16, 128>}, {pipeline_mode = #tpu.pipeline_mode<synchronous>, transform_indices = @transform_4, window_bounds = array<i64: 1, 128>}, {pipeline_mode = #tpu.pipeline_mode<synchronous>, transform_indices = @transform_5, window_bounds = array<i64: 128, 128>}, {pipeline_mode = #tpu.pipeline_mode<synchronous>, transform_indices = @transform_6, window_bounds = array<i64: 1, 128>}, {pipeline_mode = #tpu.pipeline_mode<synchronous>, transform_indices = @transform_7, window_bounds = array<i64: 128, 128>}, {pipeline_mode = #tpu.pipeline_mode<synchronous>, transform_indices = @transform_8, window_bounds = array<i64: 1, 128>}, {pipeline_mode = #tpu.pipeline_mode<synchronous>, transform_indices = @transform_9, window_bounds = array<i64: 128, 128>}, {pipeline_mode = #tpu.pipeline_mode<synchronous>, transform_indices = @transform_10, window_bounds = array<i64: 1, 128>}, {pipeline_mode = #tpu.pipeline_mode<synchronous>, transform_indices = @transform_11, window_bounds = array<i64: 128, 128>}, {pipeline_mode = #tpu.pipeline_mode<synchronous>, transform_indices = @transform_12, window_bounds = array<i64: 1, 128>}, {pipeline_mode = #tpu.pipeline_mode<synchronous>, transform_indices = @transform_13, window_bounds = array<i64: 128, 128>}, {pipeline_mode = #tpu.pipeline_mode<synchronous>, transform_indices = @transform_14, window_bounds = array<i64: 1, 128>}, {transform_indices = @transform_15, window_bounds = array<i64: 8, 128>}, {transform_indices = @transform_16, window_bounds = array<i64: 8, 128>}]} {
    %c0 = arith.constant 0 : index
    %c0_0 = arith.constant 0 : index
    %0 = vector.load %arg3[%c0, %c0_0] : memref<32x128xbf16, #tpu.memory_space<vmem>>, vector<32x128xbf16>
    %c0_1 = arith.constant 0 : index
    %c0_2 = arith.constant 0 : index
    %1 = vector.load %arg1[%c0_1, %c0_2] : memref<8x32xf32, #tpu.memory_space<vmem>>, vector<8x32xf32>
    %2 = arith.truncf %1 : vector<8x32xf32> to vector<8x32xbf16>
    %c0_3 = arith.constant 0 : index
    %c0_4 = arith.constant 0 : index
    %3 = vector.load %arg2[%c0_3, %c0_4] : memref<8x16xf32, #tpu.memory_space<vmem>>, vector<8x16xf32>
    %4 = arith.truncf %3 : vector<8x16xf32> to vector<8x16xbf16>
    %cst = arith.constant dense<0.000000e+00> : vector<8x128xf32>
    %5 = tpu.matmul %2, %0, %cst {dimension_numbers = #tpu.dot_dimension_numbers<[1], [0], [0], [1], [0, 0, 1, 1], [], []>} : vector<8x32xbf16>, vector<32x128xbf16>, vector<8x128xf32> -> vector<8x128xf32>
    %c0_5 = arith.constant 0 : index
    %c0_6 = arith.constant 0 : index
    %6 = vector.load %arg4[%c0_5, %c0_6] : memref<16x128xbf16, #tpu.memory_space<vmem>>, vector<16x128xbf16>
    %cst_7 = arith.constant dense<0.000000e+00> : vector<8x128xf32>
    %7 = tpu.matmul %4, %6, %cst_7 {dimension_numbers = #tpu.dot_dimension_numbers<[1], [0], [0], [1], [0, 0, 1, 1], [], []>} : vector<8x16xbf16>, vector<16x128xbf16>, vector<8x128xf32> -> vector<8x128xf32>
    %8 = arith.addf %5, %7 : vector<8x128xf32>
    %c0_8 = arith.constant 0 : index
    %c0_9 = arith.constant 0 : index
    %9 = vector.load %arg5[%c0_8, %c0_9] : memref<1x128xf32, #tpu.memory_space<vmem>>, vector<1x128xf32>
    %10 = vector.broadcast %9 : vector<1x128xf32> to vector<8x128xf32>
    %11 = arith.addf %8, %10 : vector<8x128xf32>
    %cst_10 = arith.constant 0.000000e+00 : f32
    %12 = vector.broadcast %cst_10 : f32 to vector<8x128xf32>
    %13 = arith.maximumf %11, %12 : vector<8x128xf32>
    %14 = arith.truncf %13 : vector<8x128xf32> to vector<8x128xbf16>
    %c0_11 = arith.constant 0 : index
    %c0_12 = arith.constant 0 : index
    %15 = vector.load %arg6[%c0_11, %c0_12] : memref<128x128xbf16, #tpu.memory_space<vmem>>, vector<128x128xbf16>
    %cst_13 = arith.constant dense<0.000000e+00> : vector<8x128xf32>
    %16 = tpu.matmul %14, %15, %cst_13 {dimension_numbers = #tpu.dot_dimension_numbers<[1], [0], [0], [1], [0, 0, 1, 1], [], []>} : vector<8x128xbf16>, vector<128x128xbf16>, vector<8x128xf32> -> vector<8x128xf32>
    %c0_14 = arith.constant 0 : index
    %c0_15 = arith.constant 0 : index
    %17 = vector.load %arg7[%c0_14, %c0_15] : memref<1x128xf32, #tpu.memory_space<vmem>>, vector<1x128xf32>
    %18 = vector.broadcast %17 : vector<1x128xf32> to vector<8x128xf32>
    %19 = arith.addf %16, %18 : vector<8x128xf32>
    %cst_16 = arith.constant 0.000000e+00 : f32
    %20 = vector.broadcast %cst_16 : f32 to vector<8x128xf32>
    %21 = arith.maximumf %19, %20 : vector<8x128xf32>
    %22 = arith.truncf %21 : vector<8x128xf32> to vector<8x128xbf16>
    %c0_17 = arith.constant 0 : index
    %c0_18 = arith.constant 0 : index
    %23 = vector.load %arg8[%c0_17, %c0_18] : memref<128x128xbf16, #tpu.memory_space<vmem>>, vector<128x128xbf16>
    %cst_19 = arith.constant dense<0.000000e+00> : vector<8x128xf32>
    %24 = tpu.matmul %22, %23, %cst_19 {dimension_numbers = #tpu.dot_dimension_numbers<[1], [0], [0], [1], [0, 0, 1, 1], [], []>} : vector<8x128xbf16>, vector<128x128xbf16>, vector<8x128xf32> -> vector<8x128xf32>
    %c0_20 = arith.constant 0 : index
    %c0_21 = arith.constant 0 : index
    %25 = vector.load %arg9[%c0_20, %c0_21] : memref<1x128xf32, #tpu.memory_space<vmem>>, vector<1x128xf32>
    %26 = vector.broadcast %25 : vector<1x128xf32> to vector<8x128xf32>
    %27 = arith.addf %24, %26 : vector<8x128xf32>
    %cst_22 = arith.constant 0.000000e+00 : f32
    %28 = vector.broadcast %cst_22 : f32 to vector<8x128xf32>
    %29 = arith.maximumf %27, %28 : vector<8x128xf32>
    %30 = arith.truncf %29 : vector<8x128xf32> to vector<8x128xbf16>
    %c0_23 = arith.constant 0 : index
    %c0_24 = arith.constant 0 : index
    %31 = vector.load %arg10[%c0_23, %c0_24] : memref<128x128xbf16, #tpu.memory_space<vmem>>, vector<128x128xbf16>
    %cst_25 = arith.constant dense<0.000000e+00> : vector<8x128xf32>
    %32 = tpu.matmul %30, %31, %cst_25 {dimension_numbers = #tpu.dot_dimension_numbers<[1], [0], [0], [1], [0, 0, 1, 1], [], []>} : vector<8x128xbf16>, vector<128x128xbf16>, vector<8x128xf32> -> vector<8x128xf32>
    %c0_26 = arith.constant 0 : index
    %c0_27 = arith.constant 0 : index
    %33 = vector.load %arg11[%c0_26, %c0_27] : memref<1x128xf32, #tpu.memory_space<vmem>>, vector<1x128xf32>
    %34 = vector.broadcast %33 : vector<1x128xf32> to vector<8x128xf32>
    %35 = arith.addf %32, %34 : vector<8x128xf32>
    %cst_28 = arith.constant 0.000000e+00 : f32
    %36 = vector.broadcast %cst_28 : f32 to vector<8x128xf32>
    %37 = arith.maximumf %35, %36 : vector<8x128xf32>
    %38 = arith.truncf %37 : vector<8x128xf32> to vector<8x128xbf16>
    %c0_29 = arith.constant 0 : index
    %c0_30 = arith.constant 0 : index
    %39 = vector.load %arg12[%c0_29, %c0_30] : memref<128x128xbf16, #tpu.memory_space<vmem>>, vector<128x128xbf16>
    %cst_31 = arith.constant dense<0.000000e+00> : vector<8x128xf32>
    %40 = tpu.matmul %38, %39, %cst_31 {dimension_numbers = #tpu.dot_dimension_numbers<[1], [0], [0], [1], [0, 0, 1, 1], [], []>} : vector<8x128xbf16>, vector<128x128xbf16>, vector<8x128xf32> -> vector<8x128xf32>
    %c0_32 = arith.constant 0 : index
    %c0_33 = arith.constant 0 : index
    %41 = vector.load %arg13[%c0_32, %c0_33] : memref<1x128xf32, #tpu.memory_space<vmem>>, vector<1x128xf32>
    %42 = vector.broadcast %41 : vector<1x128xf32> to vector<8x128xf32>
    %43 = arith.addf %40, %42 : vector<8x128xf32>
    %c0_34 = arith.constant 0 : index
    %c0_35 = arith.constant 0 : index
    %44 = vector.load %arg14[%c0_34, %c0_35] : memref<128x128xbf16, #tpu.memory_space<vmem>>, vector<128x128xbf16>
    %cst_36 = arith.constant dense<0.000000e+00> : vector<8x128xf32>
    %45 = tpu.matmul %38, %44, %cst_36 {dimension_numbers = #tpu.dot_dimension_numbers<[1], [0], [0], [1], [0, 0, 1, 1], [], []>} : vector<8x128xbf16>, vector<128x128xbf16>, vector<8x128xf32> -> vector<8x128xf32>
    %c0_37 = arith.constant 0 : index
    %c0_38 = arith.constant 0 : index
    %46 = vector.load %arg15[%c0_37, %c0_38] : memref<1x128xf32, #tpu.memory_space<vmem>>, vector<1x128xf32>
    %47 = vector.broadcast %46 : vector<1x128xf32> to vector<8x128xf32>
    %48 = arith.addf %45, %47 : vector<8x128xf32>
    %cst_39 = arith.constant 0.000000e+00 : f32
    %49 = vector.broadcast %cst_39 : f32 to vector<8x128xf32>
    %50 = arith.maximumf %48, %49 : vector<8x128xf32>
    %51 = vector.broadcast %cst_39 : f32 to vector<8x128xf32>
    %52 = arith.subf %48, %51 : vector<8x128xf32>
    %53 = arith.cmpf one, %52, %52 : vector<8x128xf32>
    %54 = vector.broadcast %cst_39 : f32 to vector<8x128xf32>
    %55 = arith.addf %48, %54 : vector<8x128xf32>
    %56 = math.absf %52 : vector<8x128xf32>
    %cst_40 = arith.constant 0.000000e+00 : f32
    %57 = vector.broadcast %cst_40 : f32 to vector<8x128xf32>
    %58 = arith.subf %57, %56 : vector<8x128xf32>
    %59 = math.exp %58 : vector<8x128xf32>
    %60 = math.log1p %59 : vector<8x128xf32>
    %61 = arith.addf %50, %60 : vector<8x128xf32>
    %62 = arith.select %53, %55, %61 : vector<8x128xi1>, vector<8x128xf32>
    %cst_41 = arith.constant 9.99999974E-5 : f32
    %63 = vector.broadcast %cst_41 : f32 to vector<8x128xf32>
    %64 = arith.addf %62, %63 : vector<8x128xf32>
    %c0_42 = arith.constant 0 : index
    %c0_43 = arith.constant 0 : index
    %65 = vector.load %arg16[%c0_42, %c0_43] : memref<8x128xf32, #tpu.memory_space<vmem>>, vector<8x128xf32>
    tpu.vector_store %arg16[%c0_42, %c0_43], %43 {strides = array<i32>} : memref<8x128xf32, #tpu.memory_space<vmem>>, vector<8x128xf32>,
    %c0_44 = arith.constant 0 : index
    %c0_45 = arith.constant 0 : index
    %66 = vector.load %arg17[%c0_44, %c0_45] : memref<8x128xf32, #tpu.memory_space<vmem>>, vector<8x128xf32>
    tpu.vector_store %arg17[%c0_44, %c0_45], %64 {strides = array<i32>} : memref<8x128xf32, #tpu.memory_space<vmem>>, vector<8x128xf32>,
    return
  }
  func.func @transform_0(%arg0: i32) -> (i32, i32) {
    %c0_i32 = arith.constant 0 : i32
    %c0_i32_0 = arith.constant 0 : i32
    return %arg0, %c0_i32 : i32, i32
  }
  func.func @transform_1(%arg0: i32) -> (i32, i32) {
    %c0_i32 = arith.constant 0 : i32
    %c0_i32_0 = arith.constant 0 : i32
    return %arg0, %c0_i32 : i32, i32
  }
  func.func @transform_2(%arg0: i32) -> (i32, i32) {
    %c0_i32 = arith.constant 0 : i32
    %c0_i32_0 = arith.constant 0 : i32
    %c0_i32_1 = arith.constant 0 : i32
    return %c0_i32, %c0_i32_0 : i32, i32
  }
  func.func @transform_3(%arg0: i32) -> (i32, i32) {
    %c0_i32 = arith.constant 0 : i32
    %c0_i32_0 = arith.constant 0 : i32
    %c0_i32_1 = arith.constant 0 : i32
    return %c0_i32, %c0_i32_0 : i32, i32
  }
  func.func @transform_4(%arg0: i32) -> (i32, i32) {
    %c0_i32 = arith.constant 0 : i32
    %c0_i32_0 = arith.constant 0 : i32
    %c0_i32_1 = arith.constant 0 : i32
    return %c0_i32, %c0_i32_0 : i32, i32
  }
  func.func @transform_5(%arg0: i32) -> (i32, i32) {
    %c0_i32 = arith.constant 0 : i32
    %c0_i32_0 = arith.constant 0 : i32
    %c0_i32_1 = arith.constant 0 : i32
    return %c0_i32, %c0_i32_0 : i32, i32
  }
  func.func @transform_6(%arg0: i32) -> (i32, i32) {
    %c0_i32 = arith.constant 0 : i32
    %c0_i32_0 = arith.constant 0 : i32
    %c0_i32_1 = arith.constant 0 : i32
    return %c0_i32, %c0_i32_0 : i32, i32
  }
  func.func @transform_7(%arg0: i32) -> (i32, i32) {
    %c0_i32 = arith.constant 0 : i32
    %c0_i32_0 = arith.constant 0 : i32
    %c0_i32_1 = arith.constant 0 : i32
    return %c0_i32, %c0_i32_0 : i32, i32
  }
  func.func @transform_8(%arg0: i32) -> (i32, i32) {
    %c0_i32 = arith.constant 0 : i32
    %c0_i32_0 = arith.constant 0 : i32
    %c0_i32_1 = arith.constant 0 : i32
    return %c0_i32, %c0_i32_0 : i32, i32
  }
  func.func @transform_9(%arg0: i32) -> (i32, i32) {
    %c0_i32 = arith.constant 0 : i32
    %c0_i32_0 = arith.constant 0 : i32
    %c0_i32_1 = arith.constant 0 : i32
    return %c0_i32, %c0_i32_0 : i32, i32
  }
  func.func @transform_10(%arg0: i32) -> (i32, i32) {
    %c0_i32 = arith.constant 0 : i32
    %c0_i32_0 = arith.constant 0 : i32
    %c0_i32_1 = arith.constant 0 : i32
    return %c0_i32, %c0_i32_0 : i32, i32
  }
  func.func @transform_11(%arg0: i32) -> (i32, i32) {
    %c0_i32 = arith.constant 0 : i32
    %c0_i32_0 = arith.constant 0 : i32
    %c0_i32_1 = arith.constant 0 : i32
    return %c0_i32, %c0_i32_0 : i32, i32
  }
  func.func @transform_12(%arg0: i32) -> (i32, i32) {
    %c0_i32 = arith.constant 0 : i32
    %c0_i32_0 = arith.constant 0 : i32
    %c0_i32_1 = arith.constant 0 : i32
    return %c0_i32, %c0_i32_0 : i32, i32
  }
  func.func @transform_13(%arg0: i32) -> (i32, i32) {
    %c0_i32 = arith.constant 0 : i32
    %c0_i32_0 = arith.constant 0 : i32
    %c0_i32_1 = arith.constant 0 : i32
    return %c0_i32, %c0_i32_0 : i32, i32
  }
  func.func @transform_14(%arg0: i32) -> (i32, i32) {
    %c0_i32 = arith.constant 0 : i32
    %c0_i32_0 = arith.constant 0 : i32
    %c0_i32_1 = arith.constant 0 : i32
    return %c0_i32, %c0_i32_0 : i32, i32
  }
  func.func @transform_15(%arg0: i32) -> (i32, i32) {
    %c0_i32 = arith.constant 0 : i32
    %c0_i32_0 = arith.constant 0 : i32
    return %arg0, %c0_i32 : i32, i32
  }
  func.func @transform_16(%arg0: i32) -> (i32, i32) {
    %c0_i32 = arith.constant 0 : i32
    %c0_i32_0 = arith.constant 0 : i32
    return %arg0, %c0_i32 : i32, i32
  }
}

</mosaic_0001>

<bundles_post_ra>
// kernel: tpu_custom_call.1
= control target key start
LH: loop header
LB: loop body
LE: loop exit
PB: predicated region body
PF: predicated region fallthrough
CT: control target
= control target key end

     0   :  { %s1726_s0 = inlined_call_operand.hbm [shape: f32[8,32], index: 0, kind: input, shape index: {}]   ;;  %s1727_s1 = inlined_call_operand.hbm [shape: f32[8,16], index: 1, kind: input, shape index: {}]   ;;  %s1728_s2 = inlined_call_operand.hbm [shape: bf16[32,128], index: 2, kind: input, shape index: {}]   ;;  %s1729_s3 = inlined_call_operand.vmem [shape: bf16[16,128], index: 3, kind: input, shape index: {}]   ;;  %s1730_s4 = inlined_call_operand.vmem [shape: f32[1,128], index: 4, kind: input, shape index: {}]   ;;  %s1731_s5 = inlined_call_operand.hbm [shape: bf16[128,128], index: 5, kind: input, shape index: {}]   ;;  %s1732_s6 = inlined_call_operand.vmem [shape: f32[1,128], index: 6, kind: input, shape index: {}]   ;;  %s1733_s7 = inlined_call_operand.hbm [shape: bf16[128,128], index: 7, kind: input, shape index: {}]   ;;  %s1734_s8 = inlined_call_operand.vmem [shape: f32[1,128], index: 8, kind: input, shape index: {}]   ;;  %s1735_s9 = inlined_call_operand.hbm [shape: bf16[128,128], index: 9, kind: input, shape index: {}]   ;;  %s1736_s10 = inlined_call_operand.vmem [shape: f32[1,128], index: 10, kind: input, shape index: {}]   ;;  %s1737_s11 = inlined_call_operand.hbm [shape: bf16[128,128], index: 11, kind: input, shape index: {}]   ;;  %s1738_s12 = inlined_call_operand.vmem [shape: f32[1,128], index: 12, kind: input, shape index: {}]   ;;  %s1739_s13 = inlined_call_operand.hbm [shape: bf16[128,128], index: 13, kind: input, shape index: {}]   ;;  %s1740_s14 = inlined_call_operand.vmem [shape: f32[1,128], index: 14, kind: input, shape index: {}]   ;;  %s1741_s15 = inlined_call_operand.hbm [shape: f32[8,128], index: 15, kind: output, shape index: {0}]   ;;  %s1742_s16 = inlined_call_operand.hbm [shape: f32[8,128], index: 16, kind: output, shape index: {1}]  }
   0x1   :  { %1744 = sst [smem:[#allocation26_spill]] %s1726_s0 }
   0x2   :  { %22 = vsyncpa [#allocation3], 0 }
   0x3   :  { %23 = vsyncpa [#allocation6], 0 }
   0x4   :  { %24 = vsyncpa [#allocation9], 0 }
   0x5   :  { %25 = vsyncpa [#allocation12], 0 }
   0x6   :  { %26 = vsyncpa [#allocation15], 0 }
   0x7   :  { %27 = vsyncpa [#allocation4], 0 }
   0x8   :  { %28 = vsyncpa [#allocation18], 0  ;;  %s1411_s21 = smov [#allocation5]   ;;  %s1177_s25 = scalar_lea.hbm %s1727_s1, 128 }
   0x9   :  { %s45_s22 = sshll.u32 %s1411_s21, 4  ;;  %p1178_p0 = scmp.ne.s32.totalorder %s1727_s1, %s1177_s25  ;;  %s46_s22 = int_to_ptr.vmem [resolvable:$true] %s45_s22 }
   0xa   :  { %p1181_p1 = scmp.lt.u32.totalorder %s1177_s25, %s1727_s1 }
   0xc   :  { %p1183_p2 = pnand %p1181_p1, %p1178_p0 }
   0xe   :  { %1186 = shalt.err (!%p1183_p2)
}
   0xf   :  { %s1187_s30 = scalar_lea.vmem %s46_s22, 128  ;;  %p1192_p4 = scmp.lt.s32.totalorder %s46_s22, %s46_s22 }
  0x10   :  { %p1188_p3 = scmp.ne.s32.totalorder %s46_s22, %s1187_s30  ;;  %p1193_p5 = scmp.lt.s32.totalorder %s1187_s30, %s1187_s30 }
  0x12   :  { %p1194_p6 = por %p1193_p5, %p1192_p4 }
  0x14   :  { %p1195_p7 = pnand %p1194_p6, %p1188_p3 }
  0x16   :  { %1198 = shalt.err (!%p1195_p7)
}
  0x17   :  { %48 = dma.hbm_to_vmem [thread:$0]  %s1727_s1, 128, %s46_s22, [#allocation6]  }
  0x18   :  { %s1412_s18 = smov [#allocation8]   ;;  %s1413_s20 = smov [#allocation11]  }
  0x19   :  { %s70_s19 = sshll.u32 %s1412_s18, 4  ;;  %s98_s21 = sshll.u32 %s1413_s20, 4  ;;  %s71_s19 = int_to_ptr.vmem [resolvable:$true] %s70_s19  ;;  %s99_s21 = int_to_ptr.vmem [resolvable:$true] %s98_s21 }
  0x1a   :  { %s1199_s25 = scalar_lea.hbm %s1731_s5, 1024 }
  0x1b   :  { %p1200_p8 = scmp.ne.s32.totalorder %s1731_s5, %s1199_s25  ;;  %p1203_p9 = scmp.lt.u32.totalorder %s1199_s25, %s1731_s5 }
  0x1d   :  { %p1205_p10 = pnand %p1203_p9, %p1200_p8 }
  0x1f   :  { %1208 = shalt.err (!%p1205_p10)
}
  0x20   :  { %s1209_s1 = scalar_lea.vmem %s71_s19, 1024  ;;  %p1214_p12 = scmp.lt.s32.totalorder %s71_s19, %s71_s19 }
  0x21   :  { %p1210_p11 = scmp.ne.s32.totalorder %s71_s19, %s1209_s1  ;;  %p1215_p13 = scmp.lt.s32.totalorder %s1209_s1, %s1209_s1 }
  0x23   :  { %p1216_p0 = por %p1215_p13, %p1214_p12 }
  0x25   :  { %p1217_p1 = pnand %p1216_p0, %p1210_p11 }
  0x27   :  { %1220 = shalt.err (!%p1217_p1)
}
  0x28   :  { %s1414_s22 = smov 64   ;;  %s1415_s30 = smov 4  }
  0x29   :  { %76 = dma.hbm_to_vmem [thread:$0]  %s1731_s5, 1024, %s71_s19, [#allocation9], %s1414_s22, %s1414_s22, %s1415_s30  }
  0x2a   :  { %s1221_s23 = scalar_lea.hbm %s1735_s9, 1024 }
  0x2b   :  { %p1222_p2 = scmp.ne.s32.totalorder %s1735_s9, %s1221_s23  ;;  %p1225_p3 = scmp.lt.u32.totalorder %s1221_s23, %s1735_s9 }
  0x2d   :  { %p1227_p4 = pnand %p1225_p3, %p1222_p2 }
  0x2f   :  { %1230 = shalt.err (!%p1227_p4)
}
  0x30   :  { %s1231_s28 = scalar_lea.vmem %s99_s21, 1024  ;;  %p1236_p6 = scmp.lt.s32.totalorder %s99_s21, %s99_s21 }
  0x31   :  { %p1232_p5 = scmp.ne.s32.totalorder %s99_s21, %s1231_s28  ;;  %p1237_p7 = scmp.lt.s32.totalorder %s1231_s28, %s1231_s28 }
  0x33   :  { %p1238_p8 = por %p1237_p7, %p1236_p6 }
  0x35   :  { %p1239_p9 = pnand %p1238_p8, %p1232_p5 }
  0x37   :  { %1242 = shalt.err (!%p1239_p9)
}
  0x38   :  { %104 = dma.hbm_to_vmem [thread:$0]  %s1735_s9, 1024, %s99_s21, [#allocation12], %s1414_s22, %s1414_s22, %s1415_s30  }
  0x39   :  { %s1416_s29 = smov [#allocation2]   ;;  %s1417_s0 = smov [#allocation7]  }
  0x3a   :  { %s35_s1 = sshll.u32 %s1416_s29, 4  ;;  %s54_s17 = sshll.u32 %s1417_s0, 4  ;;  %s36_s1 = int_to_ptr.vmem [resolvable:$true] %s35_s1  ;;  %s55_s17 = int_to_ptr.vmem [resolvable:$true] %s54_s17 }
  0x3b   :  { %s1745_s23 = sld [smem:[#allocation26_spill]] }
  0x41   :  { %s1243_s24 = scalar_lea.hbm %s1745_s23, 128 }
  0x42   :  { %p1244_p10 = scmp.ne.s32.totalorder %s1745_s23, %s1243_s24  ;;  %p1247_p11 = scmp.lt.u32.totalorder %s1243_s24, %s1745_s23 }
  0x44   :  { %p1249_p12 = pnand %p1247_p11, %p1244_p10 }
  0x46   :  { %1252 = shalt.err (!%p1249_p12)
}
  0x47   :  { %s1253_s9 = scalar_lea.vmem %s36_s1, 128  ;;  %p1258_p0 = scmp.lt.s32.totalorder %s36_s1, %s36_s1 }
  0x48   :  { %p1254_p13 = scmp.ne.s32.totalorder %s36_s1, %s1253_s9  ;;  %p1259_p1 = scmp.lt.s32.totalorder %s1253_s9, %s1253_s9 }
  0x4a   :  { %p1260_p2 = por %p1259_p1, %p1258_p0 }
  0x4c   :  { %p1261_p3 = pnand %p1260_p2, %p1254_p13 }
  0x4e   :  { %1264 = shalt.err (!%p1261_p3)
}
  0x4f   :  { %38 = dma.hbm_to_vmem [thread:$0]  %s1745_s23, 128, %s36_s1, [#allocation3]  }
  0x50   :  { %s1265_s0 = scalar_lea.hbm %s1728_s2, 256 }
  0x51   :  { %p1266_p4 = scmp.ne.s32.totalorder %s1728_s2, %s1265_s0  ;;  %p1269_p5 = scmp.lt.u32.totalorder %s1265_s0, %s1728_s2 }
  0x53   :  { %p1271_p6 = pnand %p1269_p5, %p1266_p4 }
  0x55   :  { %1274 = shalt.err (!%p1271_p6)
}
  0x56   :  { %s1275_s26 = scalar_lea.vmem %s55_s17, 256  ;;  %p1280_p8 = scmp.lt.s32.totalorder %s55_s17, %s55_s17 }
  0x57   :  { %p1276_p7 = scmp.ne.s32.totalorder %s55_s17, %s1275_s26  ;;  %p1281_p9 = scmp.lt.s32.totalorder %s1275_s26, %s1275_s26 }
  0x59   :  { %p1282_p10 = por %p1281_p9, %p1280_p8 }
  0x5b   :  { %p1283_p11 = pnand %p1282_p10, %p1276_p7 }
  0x5d   :  { %1286 = shalt.err (!%p1283_p11)
}
  0x5e   :  { %60 = dma.hbm_to_vmem [thread:$0]  %s1728_s2, 256, %s55_s17, [#allocation6], %s1414_s22, %s1414_s22, %s1415_s30  }
  0x5f   :  { %s1418_s27 = smov [#allocation10]   ;;  %s1419_s9 = smov [#allocation13]  }
  0x60   :  { %s84_s28 = sshll.u32 %s1418_s27, 4  ;;  %s112_s21 = sshll.u32 %s1419_s9, 4  ;;  %s85_s28 = int_to_ptr.vmem [resolvable:$true] %s84_s28  ;;  %s113_s21 = int_to_ptr.vmem [resolvable:$true] %s112_s21 }
  0x61   :  { %s1287_s29 = scalar_lea.hbm %s1733_s7, 1024 }
  0x62   :  { %p1288_p12 = scmp.ne.s32.totalorder %s1733_s7, %s1287_s29  ;;  %p1291_p13 = scmp.lt.u32.totalorder %s1287_s29, %s1733_s7 }
  0x64   :  { %p1293_p0 = pnand %p1291_p13, %p1288_p12 }
  0x66   :  { %1296 = shalt.err (!%p1293_p0)
}
  0x67   :  { %s1297_s2 = scalar_lea.vmem %s85_s28, 1024  ;;  %p1302_p2 = scmp.lt.s32.totalorder %s85_s28, %s85_s28 }
  0x68   :  { %p1298_p1 = scmp.ne.s32.totalorder %s85_s28, %s1297_s2  ;;  %p1303_p3 = scmp.lt.s32.totalorder %s1297_s2, %s1297_s2 }
  0x6a   :  { %p1304_p4 = por %p1303_p3, %p1302_p2 }
  0x6c   :  { %p1305_p5 = pnand %p1304_p4, %p1298_p1 }
  0x6e   :  { %1308 = shalt.err (!%p1305_p5)
}
  0x6f   :  { %90 = dma.hbm_to_vmem [thread:$0]  %s1733_s7, 1024, %s85_s28, [#allocation9], %s1414_s22, %s1414_s22, %s1415_s30  }
  0x70   :  { %s1309_s23 = scalar_lea.hbm %s1737_s11, 1024 }
  0x71   :  { %p1310_p6 = scmp.ne.s32.totalorder %s1737_s11, %s1309_s23  ;;  %p1313_p7 = scmp.lt.u32.totalorder %s1309_s23, %s1737_s11 }
  0x73   :  { %p1315_p8 = pnand %p1313_p7, %p1310_p6 }
  0x75   :  { %1318 = shalt.err (!%p1315_p8)
}
  0x76   :  { %s1319_s29 = scalar_lea.vmem %s113_s21, 1024  ;;  %p1324_p10 = scmp.lt.s32.totalorder %s113_s21, %s113_s21 }
  0x77   :  { %p1320_p9 = scmp.ne.s32.totalorder %s113_s21, %s1319_s29  ;;  %p1325_p11 = scmp.lt.s32.totalorder %s1319_s29, %s1319_s29 }
  0x79   :  { %p1326_p12 = por %p1325_p11, %p1324_p10 }
  0x7b   :  { %p1327_p13 = pnand %p1326_p12, %p1320_p9 }
  0x7d   :  { %1330 = shalt.err (!%p1327_p13)
}
  0x7e   :  { %118 = dma.hbm_to_vmem [thread:$0]  %s1737_s11, 1024, %s113_s21, [#allocation12], %s1414_s22, %s1414_s22, %s1415_s30  }
  0x7f   :  { %s1420_s0 = smov [#allocation14]   ;;  %s1331_s2 = scalar_lea.hbm %s1739_s13, 1024 }
  0x80   :  { %s126_s18 = sshll.u32 %s1420_s0, 4  ;;  %p1332_p0 = scmp.ne.s32.totalorder %s1739_s13, %s1331_s2  ;;  %s127_s18 = int_to_ptr.vmem [resolvable:$true] %s126_s18 }
  0x81   :  { %p1335_p1 = scmp.lt.u32.totalorder %s1331_s2, %s1739_s13 }
  0x83   :  { %p1337_p2 = pnand %p1335_p1, %p1332_p0 }
  0x85   :  { %1340 = shalt.err (!%p1337_p2)
}
  0x86   :  { %s1341_s23 = scalar_lea.vmem %s127_s18, 1024  ;;  %p1346_p4 = scmp.lt.s32.totalorder %s127_s18, %s127_s18 }
  0x87   :  { %p1342_p3 = scmp.ne.s32.totalorder %s127_s18, %s1341_s23  ;;  %p1347_p5 = scmp.lt.s32.totalorder %s1341_s23, %s1341_s23 }
  0x89   :  { %p1348_p6 = por %p1347_p5, %p1346_p4 }
  0x8b   :  { %p1349_p7 = pnand %p1348_p6, %p1342_p3 }
  0x8d   :  { %1352 = shalt.err (!%p1349_p7)
}
  0x8e   :  { %132 = dma.hbm_to_vmem [thread:$0]  %s1739_s13, 1024, %s127_s18, [#allocation15], %s1414_s22, %s1414_s22, %s1415_s30  }
  0x8f   :  { %1397 = dma.done.wait [#allocation3], 128  }
  0x90   :  { %1398 = vsyncadd [#allocation3], 4294967168 }
  0x91   :  { %1399 = dma.done.wait [#allocation6], 384  }
  0x92   :  { %1400 = vsyncadd [#allocation6], 4294966912 }
  0x93   :  { %1401 = dma.done.wait [#allocation9], 2048  }
  0x94   :  { %1402 = vsyncadd [#allocation9], 4294965248 }
  0x95   :  { %1403 = dma.done.wait [#allocation12], 2048  }
  0x96   :  { %1404 = vsyncadd [#allocation12], 4294965248 }
  0x97   :  { %1405 = dma.done.wait [#allocation15], 1024  }
  0x98   :  { %1406 = vsyncadd [#allocation15], 4294966272  ;;  %v1421_v0 = vmov 0.0   ;;  %vm1422_vm0 = vmmov 0   ;;  %v1130_v1 = vld [vmem:[%s1729_s3] sm:$0xff]   ;;  %v166_v2 = vld [vmem:[#allocation5] sm:$0xff] }
  0x99   :  { %1002 = vmatprep.subr.bf16.mxu1 %v1421_v0  ;;  %1004 = vmatprep.mubr.msk.bf16.mxu1 %vm1422_vm0, %v1421_v0  ;;  %v167_v3 = vpack.c.bf16 %v166_v2, %v166_v2  ;;  %vm176_vm1 = vcmask 130048   ;;  %v1131_v4 = vld [vmem:[#allocation7] sm:$0xff]   ;;  %v1133_v5 = vld [vmem:[#allocation8] sm:$0xff]   ;;  %v1132_v6 = vld [vmem:[#allocation7 + $0x8] sm:$0xff]   ;;  %vm232_vm2 = vcmask 261120   ;;  %s1423_s0 = smov [#allocation16]  }
  0x9a   :  { %1016 = vmatprep.subr.bf16.mxu0 %v1421_v0  ;;  %1032 = vmatprep.mubr.msk.bf16.mxu0 %vm1422_vm0, %v1421_v0  ;;  %v164_v7 = vld [vmem:[#allocation2] sm:$0xff]  ;;  %v1134_v8 = vld [vmem:[#allocation8 + $0x8] sm:$0xff]   ;;  %v1135_v10 = vld [vmem:[#allocation8 + $0x10] sm:$0xff]   ;;  %s874_s18 = sshll.u32 %s1423_s0, 4  ;;  %s875_s18 = int_to_ptr.vmem [resolvable:$true] %s874_s18 }
  0x9b   :  { %1003 = vmatpush3.bf16.msra.mxu1 %v1130_v1  ;;  %1017 = vmatpush3.bf16.msra.mxu0 %v1133_v5  ;;  %v165_v9 = vpack.c.bf16 %v164_v7, %v164_v7  ;;  %v1136_v11 = vld [vmem:[#allocation8 + $0x18] sm:$0xff]   ;;  %v1137_v12 = vld [vmem:[#allocation8 + $0x20] sm:$0xff]   ;;  %v1138_v13 = vld [vmem:[#allocation8 + $0x28] sm:$0xff]   ;;  %p1358_p9 = scmp.lt.s32.totalorder %s875_s18, %s875_s18 }
  0x9c   :  { %1008 = vmatprep.subr.bf16.mxu1 %v1421_v0  ;;  %1018 = vmatprep.subr.bf16.mxu0 %v1421_v0  ;;  %v1139_v14 = vld [vmem:[#allocation8 + $0x30] sm:$0xff]   ;;  %v1140_v15 = vld [vmem:[#allocation8 + $0x38] sm:$0xff]   ;;  %v1141_v16 = vld [vmem:[#allocation10] sm:$0xff]  }
  0x9d   :  { %v1142_v17 = vld [vmem:[#allocation10 + $0x8] sm:$0xff]   ;;  %v1143_v18 = vld [vmem:[#allocation10 + $0x10] sm:$0xff]   ;;  %v1144_v19 = vld [vmem:[#allocation10 + $0x18] sm:$0xff]  }
  0x9e   :  { %1005 = vmatmul.mubr.msk.bf16.vlgmr.msra.gmra.mrb[0].mxu1 %vm176_vm1, %v167_v3  ;;  %v1145_v20 = vld [vmem:[#allocation10 + $0x20] sm:$0xff]   ;;  %v1146_v21 = vld [vmem:[#allocation10 + $0x28] sm:$0xff]   ;;  %v1147_v35 = vld [vmem:[#allocation10 + $0x30] sm:$0xff]  }
  0x9f   :  { %1009 = vmatpush3.bf16.msra.mxu1 %v1131_v4  ;;  %1012 = vmatprep.mubr.msk.bf16.mxu1 %vm1422_vm0, %v1421_v0  ;;  %v906_v27 = vld [vmem:[%s1730_s4] ss:$0 sm:$0xff]  ;;  %v1148_v36 = vld [vmem:[#allocation10 + $0x38] sm:$0xff]   ;;  %v1150_v38 = vld [vmem:[#allocation11 + $0x8] sm:$0xff]  }
  0xa0   :  { %1010 = vmatprep.subr.bf16.mxu1 %v1421_v0  ;;  %1019 = vmatpush3.bf16.msra.mxu0 %v1134_v8  ;;  %v1149_v37 = vld [vmem:[#allocation11] sm:$0xff]   ;;  %v1151_v39 = vld [vmem:[#allocation11 + $0x10] sm:$0xff]   ;;  %v1152_v40 = vld [vmem:[#allocation11 + $0x18] sm:$0xff]  }
  0xa1   :  { %1020 = vmatprep.subr.bf16.mxu0 %v1421_v0  ;;  %v1153_v41 = vld [vmem:[#allocation11 + $0x20] sm:$0xff]   ;;  %v1154_v42 = vld [vmem:[#allocation11 + $0x28] sm:$0xff]   ;;  %v1155_v51 = vld [vmem:[#allocation11 + $0x30] sm:$0xff]  }
  0xa2   :  { %v907_v43 = vld [vmem:[%s1732_s6] ss:$0 sm:$0xff]  ;;  %v1156_v52 = vld [vmem:[#allocation11 + $0x38] sm:$0xff]   ;;  %v1159_v54 = vld [vmem:[#allocation13 + $0x8] sm:$0xff]  }
  0xa3   :  { %1011 = vmatpush3.bf16.msra.mxu1 %v1132_v6  ;;  %v1157_v53 = vld [vmem:[#allocation13] sm:$0xff]   ;;  %v1161_v55 = vld [vmem:[#allocation13 + $0x10] sm:$0xff]   ;;  %v1163_v56 = vld [vmem:[#allocation13 + $0x18] sm:$0xff]  }
  0xa4   :  { %1036 = vmatprep.subr.bf16.mxu1 %v1421_v0  ;;  %1021 = vmatpush3.bf16.msra.mxu0 %v1135_v10  ;;  %v1165_v57 = vld [vmem:[#allocation13 + $0x20] sm:$0xff]   ;;  %v1167_v58 = vld [vmem:[#allocation13 + $0x28] sm:$0xff]   ;;  %v1162_v6 = vld [vmem:[#allocation14 + $0x10] sm:$0xff]  }
  0xa5   :  { %1022 = vmatprep.subr.bf16.mxu0 %v1421_v0  ;;  %v916_v59 = vld [vmem:[%s1734_s8] ss:$0 sm:$0xff]  ;;  %v1160_v5 = vld [vmem:[#allocation14 + $0x8] sm:$0xff]   ;;  %v1164_v7 = vld [vmem:[#allocation14 + $0x18] sm:$0xff]  }
  0xa6   :  { %1013 = vmatmul.mubr.msk.bf16.vlgmr.msra.gmra.mrb[4].mxu1 %vm232_vm2, %v165_v9  ;;  %v1158_v3 = vld [vmem:[#allocation14] sm:$0xff]   ;;  %v1168_v9 = vld [vmem:[#allocation14 + $0x28] sm:$0xff]   ;;  %v1169_v10 = vld [vmem:[#allocation13 + $0x30] sm:$0xff]  }
  0xa7   :  { %1052 = vmatprep.mubr.msk.bf16.mxu1 %vm1422_vm0, %v1421_v0  ;;  %1037 = vmatpush3.bf16.msra.mxu1 %v1141_v16  ;;  %v1166_v8 = vld [vmem:[#allocation14 + $0x20] sm:$0xff]  }
  0xa8   :  { %1023 = vmatpush3.bf16.msra.mxu0 %v1136_v11  ;;  %1038 = vmatprep.subr.bf16.mxu1 %v1421_v0  ;;  %v1170_v11 = vld [vmem:[#allocation14 + $0x30] sm:$0xff]  }
  0xa9   :  { %1024 = vmatprep.subr.bf16.mxu0 %v1421_v0 }
  0xab   :  { %1039 = vmatpush3.bf16.msra.mxu1 %v1142_v17 }
  0xac   :  { %1025 = vmatpush3.bf16.msra.mxu0 %v1137_v12  ;;  %1040 = vmatprep.subr.bf16.mxu1 %v1421_v0  ;;  %v1171_v12 = vld [vmem:[#allocation13 + $0x38] sm:$0xff]  }
  0xad   :  { %1026 = vmatprep.subr.bf16.mxu0 %v1421_v0 }
  0xaf   :  { %1041 = vmatpush3.bf16.msra.mxu1 %v1143_v18 }
  0xb0   :  { %1027 = vmatpush3.bf16.msra.mxu0 %v1138_v13  ;;  %1042 = vmatprep.subr.bf16.mxu1 %v1421_v0  ;;  %v1172_v13 = vld [vmem:[#allocation14 + $0x38] sm:$0xff]  }
  0xb1   :  { %1028 = vmatprep.subr.bf16.mxu0 %v1421_v0 }
  0xb3   :  { %1043 = vmatpush3.bf16.msra.mxu1 %v1144_v19 }
  0xb4   :  { %1029 = vmatpush3.bf16.msra.mxu0 %v1139_v14  ;;  %1044 = vmatprep.subr.bf16.mxu1 %v1421_v0  ;;  %v925_v14 = vld [vmem:[%s1736_s10] ss:$0 sm:$0xff]  ;;  %s1353_s10 = scalar_lea.vmem %s875_s18, 128 }
  0xb5   :  { %1030 = vmatprep.subr.bf16.mxu0 %v1421_v0  ;;  %p1354_p8 = scmp.ne.s32.totalorder %s875_s18, %s1353_s10  ;;  %p1359_p10 = scmp.lt.s32.totalorder %s1353_s10, %s1353_s10 }
  0xb7   :  { %1045 = vmatpush3.bf16.msra.mxu1 %v1145_v20  ;;  %p1360_p11 = por %p1359_p10, %p1358_p9 }
  0xb8   :  { %1031 = vmatpush3.bf16.msra.mxu0 %v1140_v15  ;;  %1046 = vmatprep.subr.bf16.mxu1 %v1421_v0 }
  0xb9   :  { %1056 = vmatprep.subr.bf16.mxu0 %v1421_v0  ;;  %p1361_p12 = pnand %p1360_p11, %p1354_p8 }
  0xbb   :  { %1047 = vmatpush3.bf16.msra.mxu1 %v1146_v21 }
  0xbc   :  { %1048 = vmatprep.subr.bf16.mxu1 %v1421_v0 }
  0xbf   :  { %1049 = vmatpush3.bf16.msra.mxu1 %v1147_v35 }
  0xc0   :  { %1050 = vmatprep.subr.bf16.mxu1 %v1421_v0 }
  0xc3   :  { %1051 = vmatpush3.bf16.msra.mxu1 %v1148_v36 }
  0xc4   :  { %1076 = vmatprep.subr.bf16.mxu1 %v1421_v0 }
 0x171   :  { %v214_v22 = vpop.f32.mrb[0].mxu1 }
 0x172   :  { %v1006_v23 = vpop.f32.mrb[1].mxu1 }
 0x173   :  { %v217_v24 = vpop.f32.mrb[2].mxu1 }
 0x174   :  { %v1007_v25 = vpop.f32.mrb[3].mxu1 }
 0x179   :  { %v270_v26 = vpop.f32.mrb[4].mxu1 }
 0x17a   :  { %v271_v28 = vadd.f32 %v270_v26, %v214_v22  ;;  %v1014_v29 = vpop.f32.mrb[5].mxu1  ;;  %v943_v22 = vld [vmem:[%s1740_s14] ss:$0 sm:$0xff] }
 0x17b   :  { %v273_v30 = vpop.f32.mrb[6].mxu1 }
 0x17c   :  { %v283_v31 = vadd.f32 %v906_v27, %v271_v28  ;;  %v1015_v32 = vpop.f32.mrb[7].mxu1 }
 0x17e   :  { %v284_v33 = vmax.f32 %v283_v31, 0.0 }
 0x180   :  { %v285_v34 = vpack.c.bf16 %v284_v33, %v284_v33 }
 0x182   :  { %1033 = vmatmul.mubr.bf16.vlgmr.msra.gmra.mrb[0].mxu0 %v285_v34 }
 0x183   :  { %1072 = vmatprep.mubr.msk.bf16.mxu0 %vm1422_vm0, %v1421_v0  ;;  %1057 = vmatpush3.bf16.msra.mxu0 %v1149_v37 }
 0x184   :  { %1058 = vmatprep.subr.bf16.mxu0 %v1421_v0 }
 0x187   :  { %1059 = vmatpush3.bf16.msra.mxu0 %v1150_v38 }
 0x188   :  { %1060 = vmatprep.subr.bf16.mxu0 %v1421_v0 }
 0x18b   :  { %1061 = vmatpush3.bf16.msra.mxu0 %v1151_v39 }
 0x18c   :  { %1062 = vmatprep.subr.bf16.mxu0 %v1421_v0 }
 0x18f   :  { %1063 = vmatpush3.bf16.msra.mxu0 %v1152_v40 }
 0x190   :  { %1064 = vmatprep.subr.bf16.mxu0 %v1421_v0 }
 0x193   :  { %1065 = vmatpush3.bf16.msra.mxu0 %v1153_v41 }
 0x194   :  { %1066 = vmatprep.subr.bf16.mxu0 %v1421_v0 }
 0x197   :  { %1067 = vmatpush3.bf16.msra.mxu0 %v1154_v42 }
 0x198   :  { %1068 = vmatprep.subr.bf16.mxu0 %v1421_v0 }
 0x19b   :  { %1069 = vmatpush3.bf16.msra.mxu0 %v1155_v51 }
 0x19c   :  { %1070 = vmatprep.subr.bf16.mxu0 %v1421_v0 }
 0x19f   :  { %1071 = vmatpush3.bf16.msra.mxu0 %v1156_v52 }
 0x1a0   :  { %1096 = vmatprep.subr.bf16.mxu0 %v1421_v0 }
 0x255   :  { %v391_v44 = vpop.f32.mrb[0].mxu0 }
 0x256   :  { %v392_v45 = vadd.f32 %v907_v43, %v391_v44  ;;  %v1034_v46 = vpop.f32.mrb[1].mxu0 }
 0x257   :  { %v394_v47 = vpop.f32.mrb[2].mxu0 }
 0x258   :  { %v397_v48 = vmax.f32 %v392_v45, 0.0  ;;  %v1035_v49 = vpop.f32.mrb[3].mxu0 }
 0x25a   :  { %v398_v50 = vpack.c.bf16 %v397_v48, %v397_v48 }
 0x25c   :  { %1053 = vmatmul.mubr.bf16.vlgmr.msra.gmra.mrb[8].mxu1 %v398_v50 }
 0x25d   :  { %1092 = vmatprep.mubr.msk.bf16.mxu1 %vm1422_vm0, %v1421_v0  ;;  %1077 = vmatpush3.bf16.msra.mxu1 %v1157_v53 }
 0x25e   :  { %1078 = vmatprep.subr.bf16.mxu1 %v1421_v0 }
 0x261   :  { %1079 = vmatpush3.bf16.msra.mxu1 %v1159_v54 }
 0x262   :  { %1080 = vmatprep.subr.bf16.mxu1 %v1421_v0 }
 0x265   :  { %1081 = vmatpush3.bf16.msra.mxu1 %v1161_v55 }
 0x266   :  { %1082 = vmatprep.subr.bf16.mxu1 %v1421_v0 }
 0x269   :  { %1083 = vmatpush3.bf16.msra.mxu1 %v1163_v56 }
 0x26a   :  { %1084 = vmatprep.subr.bf16.mxu1 %v1421_v0 }
 0x26d   :  { %1085 = vmatpush3.bf16.msra.mxu1 %v1165_v57 }
 0x26e   :  { %1086 = vmatprep.subr.bf16.mxu1 %v1421_v0 }
 0x271   :  { %1087 = vmatpush3.bf16.msra.mxu1 %v1167_v58 }
 0x272   :  { %1088 = vmatprep.subr.bf16.mxu1 %v1421_v0 }
 0x275   :  { %1089 = vmatpush3.bf16.msra.mxu1 %v1169_v10 }
 0x276   :  { %1090 = vmatprep.subr.bf16.mxu1 %v1421_v0 }
 0x279   :  { %1091 = vmatpush3.bf16.msra.mxu1 %v1171_v12 }
 0x32f   :  { %v504_v60 = vpop.f32.mrb[8].mxu1 }
 0x330   :  { %v505_v61 = vadd.f32 %v916_v59, %v504_v60  ;;  %v1054_v62 = vpop.f32.mrb[9].mxu1 }
 0x331   :  { %v507_v63 = vpop.f32.mrb[10].mxu1 }
 0x332   :  { %v510_v1 = vmax.f32 %v505_v61, 0.0  ;;  %v1055_v2 = vpop.f32.mrb[11].mxu1 }
 0x334   :  { %v511_v4 = vpack.c.bf16 %v510_v1, %v510_v1 }
 0x336   :  { %1073 = vmatmul.mubr.bf16.vlgmr.msra.gmra.mrb[4].mxu0 %v511_v4 }
 0x337   :  { %1097 = vmatpush3.bf16.msra.mxu0 %v1158_v3  ;;  %1112 = vmatprep.mubr.msk.bf16.mxu0 %vm1422_vm0, %v1421_v0 }
 0x338   :  { %1098 = vmatprep.subr.bf16.mxu0 %v1421_v0 }
 0x33b   :  { %1099 = vmatpush3.bf16.msra.mxu0 %v1160_v5 }
 0x33c   :  { %1100 = vmatprep.subr.bf16.mxu0 %v1421_v0 }
 0x33f   :  { %1101 = vmatpush3.bf16.msra.mxu0 %v1162_v6 }
 0x340   :  { %1102 = vmatprep.subr.bf16.mxu0 %v1421_v0 }
 0x343   :  { %1103 = vmatpush3.bf16.msra.mxu0 %v1164_v7 }
 0x344   :  { %1104 = vmatprep.subr.bf16.mxu0 %v1421_v0 }
 0x347   :  { %1105 = vmatpush3.bf16.msra.mxu0 %v1166_v8 }
 0x348   :  { %1106 = vmatprep.subr.bf16.mxu0 %v1421_v0 }
 0x34b   :  { %1107 = vmatpush3.bf16.msra.mxu0 %v1168_v9 }
 0x34c   :  { %1108 = vmatprep.subr.bf16.mxu0 %v1421_v0 }
 0x34f   :  { %1109 = vmatpush3.bf16.msra.mxu0 %v1170_v11 }
 0x350   :  { %1110 = vmatprep.subr.bf16.mxu0 %v1421_v0  ;;  %v934_v0 = vld [vmem:[%s1738_s12] ss:$0 sm:$0xff] }
 0x353   :  { %1111 = vmatpush3.bf16.msra.mxu0 %v1172_v13 }
 0x409   :  { %v617_v15 = vpop.f32.mrb[4].mxu0 }
 0x40a   :  { %v618_v16 = vadd.f32 %v925_v14, %v617_v15  ;;  %v1074_v17 = vpop.f32.mrb[5].mxu0 }
 0x40b   :  { %v620_v18 = vpop.f32.mrb[6].mxu0 }
 0x40c   :  { %v623_v19 = vmax.f32 %v618_v16, 0.0  ;;  %v1075_v20 = vpop.f32.mrb[7].mxu0 }
 0x40e   :  { %v624_v21 = vpack.c.bf16 %v623_v19, %v623_v19 }
 0x410   :  { %1093 = vmatmul.mubr.bf16.vlgmr.msra.gmra.mrb[12].mxu1 %v624_v21  ;;  %1113 = vmatmul.mubr.bf16.vlgmr.msra.gmra.mrb[8].mxu0 %v624_v21 }
 0x4e3   :  { %v730_v23 = vpop.f32.mrb[12].mxu1  ;;  %v841_v24 = vpop.f32.mrb[8].mxu0 }
 0x4e4   :  { %v731_v25 = vadd.f32 %v934_v0, %v730_v23  ;;  %v842_v26 = vadd.f32 %v943_v22, %v841_v24  ;;  %v1094_v27 = vpop.f32.mrb[13].mxu1  ;;  %v1114_v28 = vpop.f32.mrb[9].mxu0 }
 0x4e5   :  { %v733_v29 = vpop.f32.mrb[14].mxu1  ;;  %v844_v30 = vpop.f32.mrb[10].mxu0 }
 0x4e6   :  { %866 = vst [vmem:[#allocation16] sm:$0xff] %v731_v25  ;;  %v850_v31 = vand.u32 2147483647, %v842_v26  ;;  %v1095_v32 = vpop.f32.mrb[15].mxu1  ;;  %v1115_v33 = vpop.f32.mrb[11].mxu0 }
 0x4e7   :  { %1364 = shalt.err (!%p1361_p12)
}
 0x4e8   :  { %s1365_s20 = scalar_lea.hbm %s1741_s15, 128 }
 0x4e9   :  { %p1366_p13 = scmp.ne.s32.totalorder %s1741_s15, %s1365_s20  ;;  %p1369_p0 = scmp.lt.u32.totalorder %s1365_s20, %s1741_s15 }
 0x4eb   :  { %p1371_p1 = pnand %p1369_p0, %p1366_p13 }
 0x4ed   :  { %1374 = shalt.err (!%p1371_p1)
}
 0x4ee   :  { %877 = dma.vmem_to_hbm [thread:$0]  %s875_s18, 128, %s1741_s15, [#allocation4]   ;;  %v851_v34 = vsub.f32 0.0, %v850_v31  ;;  %v847_v44 = vmax.f32 %v842_v26, 0.0  ;;  %vm848_vm4 = vcmp.ne.f32.partialorder %v842_v26, %v842_v26 }
 0x4ef   :  { %s1424_s23 = smov [#allocation17]  }
 0x4f0   :  { %v852_v35 = vmul.f32 1.442695, %v851_v34  ;;  %s884_s11 = sshll.u32 %s1424_s23, 4  ;;  %s885_s11 = int_to_ptr.vmem [resolvable:$true] %s884_s11 }
 0x4f1   :  { %s1375_s15 = scalar_lea.vmem %s885_s11, 128  ;;  %p1380_p3 = scmp.lt.s32.totalorder %s885_s11, %s885_s11 }
 0x4f2   :  { %1173 = vpow2.f32 %v852_v35  ;;  %p1376_p2 = scmp.ne.s32.totalorder %s885_s11, %s1375_s15  ;;  %p1381_p4 = scmp.lt.s32.totalorder %s1375_s15, %s1375_s15 }
 0x4f4   :  { %p1382_p5 = por %p1381_p4, %p1380_p3 }
 0x4f6   :  { %p1383_p6 = pnand %p1382_p5, %p1376_p2 }
 0x4fc   :  { %v1174_v36 = vpop.eup %1173 }
 0x4fd   :  { %v854_v37 = vadd.f32 1.0, %v1174_v36  ;;  %v857_v38 = vmul.f32 -0.5, %v1174_v36  ;;  %v860_v40 = vand.u32 2147483647, %v1174_v36 }
 0x4ff   :  { %1175 = vlog2.f32 %v854_v37  ;;  %v858_v39 = vadd.f32 1.0, %v857_v38  ;;  %vm861_vm3 = vcmp.lt.f32.partialorder %v860_v40, 0.0004427343 }
 0x501   :  { %v859_v43 = vmul.f32 %v1174_v36, %v858_v39 }
 0x509   :  { %v1176_v41 = vpop.eup %1175 }
 0x50a   :  { %v856_v42 = vmul.f32 0.6931472, %v1176_v41 }
 0x50c   :  { %v862_v45 = vsel %vm861_vm3, %v859_v43, %v856_v42 }
 0x50d   :  { %v863_v46 = vadd.f32 %v862_v45, %v847_v44 }
 0x50f   :  { %v864_v47 = vsel %vm848_vm4, %v842_v26, %v863_v46 }
 0x510   :  { %v865_v48 = vadd.f32 0.0001, %v864_v47 }
 0x512   :  { %867 = vst [vmem:[#allocation17] sm:$0xff] %v865_v48 }
 0x513   :  { %1386 = shalt.err (!%p1383_p6)
}
 0x514   :  { %s1387_s22 = scalar_lea.hbm %s1742_s16, 128 }
 0x515   :  { %p1388_p7 = scmp.ne.s32.totalorder %s1742_s16, %s1387_s22  ;;  %p1391_p8 = scmp.lt.u32.totalorder %s1387_s22, %s1742_s16 }
 0x517   :  { %p1393_p9 = pnand %p1391_p8, %p1388_p7 }
 0x519   :  { %1396 = shalt.err (!%p1393_p9)
}
 0x51a   :  { %887 = dma.vmem_to_hbm [thread:$0]  %s885_s11, 128, %s1742_s16, [#allocation18]  }
 0x51b   :  { %1407 = dma.done.wait [#allocation4], 128  }
 0x51c   :  { %1408 = vsyncadd [#allocation4], 4294967168 }
 0x51d   :  { %1409 = dma.done.wait [#allocation18], 128  }
 0x51e   :  { %1410 = vsyncadd [#allocation18], 4294967168 }
 0x51f   :  { %894 = vsyncpa [#allocation3], 1 }
 0x520   :  { %895 = vsyncpa [#allocation6], 1 }
 0x521   :  { %896 = vsyncpa [#allocation9], 1 }
 0x522   :  { %897 = vsyncpa [#allocation12], 1 }
 0x523   :  { %898 = vsyncpa [#allocation15], 1 }
 0x524   :  { %899 = vsyncpa [#allocation4], 1 }
 0x525   :  { %900 = vsyncpa [#allocation18], 1 }

</bundles_post_ra>
